<compile_context>
chip_gen: v6e
topology: v6e:2x2x1
jax: 0.10.0
libtpu: 0.0.40
codegen_flags: <defaults>
</compile_context>

<pallas_src>
import functools

import jax
import jax.numpy as jnp
from jax import lax
from jax.experimental import pallas as pl
from jax.experimental.pallas import tpu as pltpu

HIDDEN = 64                 # packing assumes the module default hidden_size=64
FUSED_HIDDEN = 2 * HIDDEN   # actor + critic layer-1 outputs in one 128-lane block
OUT_WIDTH = 128             # padded, lane-dense output width


def _round_up(x, m):
    return ((x + m - 1) // m) * m


def _actor_critic_kernel(state_ref, w1_ref, b1_ref, w2_ref, b2_ref, out_ref, *, action_dim):
    x = state_ref[...].astype(jnp.float32)

    # Fused layer 1: one MXU pass producing actor hiddens (lanes 0..63) and
    # critic hiddens (lanes 64..127) at once.
    h = jnp.dot(x, w1_ref[...], preferred_element_type=jnp.float32) + b1_ref[...]
    h = jnp.maximum(h, 0.0)

    # Fused layer 2 (block-diagonal weights): logits land in lanes [0, A),
    # the critic value in lane A, zeros elsewhere. One lane-dense MXU pass.
    y = jnp.dot(h, w2_ref[...], preferred_element_type=jnp.float32) + b2_ref[...]

    col = lax.broadcasted_iota(jnp.int32, y.shape, 1)
    is_logit = col < action_dim

    # Numerically-stable softmax restricted to the first `action_dim` lanes,
    # done at full 128-lane width.
    masked = jnp.where(is_logit, y, -jnp.inf)
    m = jnp.max(masked, axis=-1, keepdims=True)
    e = jnp.exp(masked - m)                      # exp(-inf)=0 for non-logit lanes
    s = jnp.sum(e, axis=-1, keepdims=True)
    probs = e * pl.reciprocal(s, approx=False)   # exact: stays within 1e-5 tolerance

    # probs is exactly 0 outside the logit lanes, so one mul+add drops the critic
    # value into lane `action_dim` (saves one full (tb,128) select per tile).
    out = probs + y * (col == action_dim).astype(jnp.float32)
    out_ref[...] = out.astype(out_ref.dtype)


def pack_params(raw_params, action_dim, hidden_size=HIDDEN):
    """Fuse the 8 PyTorch-style (pre-transposed) weights into lane-dense blocks."""
    (w1a, b1a, w2a, b2a, w1c, b1c, w2c, b2c) = raw_params
    assert hidden_size == HIDDEN, "fused lane packing assumes hidden_size == 64"
    assert 1 <= action_dim <= OUT_WIDTH - 1, "value lane sits at index action_dim (< 128)"
    w1 = jnp.concatenate([w1a, w1c], axis=1)                       # (S, 128)
    b1 = jnp.concatenate([b1a, b1c], axis=1)                       # (1, 128)
    w2 = jnp.zeros((FUSED_HIDDEN, OUT_WIDTH), jnp.float32)
    w2 = w2.at[:HIDDEN, :action_dim].set(w2a)                      # actor block
    w2 = w2.at[HIDDEN:, action_dim:action_dim + 1].set(w2c)        # critic block
    b2 = jnp.zeros((1, OUT_WIDTH), jnp.float32)
    b2 = b2.at[:, :action_dim].set(b2a)
    b2 = b2.at[:, action_dim:action_dim + 1].set(b2c)
    return (w1, b1, w2, b2)


@functools.partial(jax.jit, static_argnames=("action_dim", "block_b", "split_outputs"))
def actor_critic_forward(state, fused_params, action_dim, block_b=2048, split_outputs=True):
    """state: (B, state_dim) f32. Returns (action_probs (B, A), value (B, 1))."""
    w1, b1, w2, b2 = fused_params
    B, S = state.shape
    assert 1 <= action_dim <= OUT_WIDTH - 1
    assert w1.shape == (S, FUSED_HIDDEN) and w2.shape == (FUSED_HIDDEN, OUT_WIDTH)

    # Batch tile: large enough to amortize ~0.35us fixed per-grid-step overhead,
    # capped so large batches keep >= 4 grid steps (work for both v7x TCs), and a
    # sublane multiple of 8.  No jnp.pad: Pallas clips the boundary block itself.
    # Working set at tb=2048 is ~2.3 MB double-buffered -> far under the scoped
    # VMEM default on every generation (v5e/v6e 32/128 MiB, v7x 32/64 MiB).
    tb = min(block_b, max(8, _round_up(pl.cdiv(B, 4), 8)))
    grid = (pl.cdiv(B, tb),)

    out = pl.pallas_call(
        functools.partial(_actor_critic_kernel, action_dim=action_dim),
        out_shape=jax.ShapeDtypeStruct((B, OUT_WIDTH), jnp.float32),
        grid=grid,
        in_specs=[
            pl.BlockSpec((tb, S), lambda i: (i, 0)),               # state: batch-tiled, pipelined
            pl.BlockSpec(w1.shape, lambda i: (0, 0)),              # fused weights stay VMEM-resident
            pl.BlockSpec(b1.shape, lambda i: (0, 0)),              # (constant index_map -> no re-DMA)
            pl.BlockSpec(w2.shape, lambda i: (0, 0)),
            pl.BlockSpec(b2.shape, lambda i: (0, 0)),
        ],
        out_specs=pl.BlockSpec((tb, OUT_WIDTH), lambda i: (i, 0)),  # lane-dense unmasked stores
        compiler_params=pltpu.CompilerParams(
            dimension_semantics=("parallel",),                      # independent batch tiles (megacore)
        ),
    )(state, w1, b1, w2, b2)

    if not split_outputs:
        return out                     # fused (B, 128) block: probs in [:A], value in lane A
    probs = out[:, :action_dim]
    value = out[:, action_dim:action_dim + 1]
    return probs, value


def init_params(key, state_dim, action_dim, hidden_size=HIDDEN):
    """PyTorch nn.Linear-style init (uniform +/- 1/sqrt(fan_in)).
    Weights stored as (in_features, out_features); biases as (1, out_features)."""
    def linear(key, fan_in, fan_out):
        kw, kb = jax.random.split(key)
        bound = 1.0 / jnp.sqrt(fan_in)
        w = jax.random.uniform(kw, (fan_in, fan_out), jnp.float32, -bound, bound)
        b = jax.random.uniform(kb, (1, fan_out), jnp.float32, -bound, bound)
        return w, b

    k1, k2, k3, k4 = jax.random.split(key, 4)
    w1a, b1a = linear(k1, state_dim, hidden_size)
    w2a, b2a = linear(k2, hidden_size, action_dim)
    w1c, b1c = linear(k3, state_dim, hidden_size)
    w2c, b2c = linear(k4, hidden_size, 1)
    return (w1a, b1a, w2a, b2a, w1c, b1c, w2c, b2c)


def reference_forward(state, raw_params):
    (w1a, b1a, w2a, b2a, w1c, b1c, w2c, b2c) = raw_params
    h_a = jnp.maximum(state @ w1a + b1a, 0.0)
    probs = jax.nn.softmax(h_a @ w2a + b2a, axis=-1)
    h_c = jnp.maximum(state @ w1c + b1c, 0.0)
    value = h_c @ w2c + b2c
    return probs, value


if __name__ == "__main__":
    key = jax.random.PRNGKey(0)
    state_dim, action_dim, hidden_size, batch = 16, 4, 64, 8

    k_params, k_state = jax.random.split(key)
    raw_params = init_params(k_params, state_dim, action_dim, hidden_size)
    fused_params = pack_params(raw_params, action_dim, hidden_size)
    state = jax.random.normal(k_state, (batch, state_dim), jnp.float32)

    probs, value = actor_critic_forward(state, fused_params, action_dim=action_dim)
    jax.block_until_ready((probs, value))

    ref_probs, ref_value = reference_forward(state, raw_params)
    assert probs.shape == (batch, action_dim)
    assert value.shape == (batch, 1)
    assert jnp.allclose(probs, ref_probs, atol=1e-5, rtol=1e-5)
    assert jnp.allclose(value, ref_value, atol=1e-5, rtol=1e-5)
    assert jnp.allclose(jnp.sum(probs, axis=-1), 1.0, atol=1e-5)

    print("KERNEL_OK")
</pallas_src>

<mosaic_0001>
module attributes {stable_mosaic.version = 11 : i64} {
  func.func @_actor_critic_kernel(%arg0: i32, %arg1: memref<8x16xf32, #tpu.memory_space<vmem>>, %arg2: memref<16x128xf32, #tpu.memory_space<vmem>>, %arg3: memref<1x128xf32, #tpu.memory_space<vmem>>, %arg4: memref<128x128xf32, #tpu.memory_space<vmem>>, %arg5: memref<1x128xf32, #tpu.memory_space<vmem>>, %arg6: memref<8x128xf32, #tpu.memory_space<vmem>>) attributes {dimension_semantics = [#tpu.dimension_semantics<parallel>], iteration_bounds = array<i64: 1>, scalar_prefetch = 0 : i64, scratch_operands = 0 : i64, tpu.core_type = #tpu.core_type<tc>, window_params = [{transform_indices = @transform_0, window_bounds = array<i64: 8, 16>}, {pipeline_mode = #tpu.pipeline_mode<synchronous>, transform_indices = @transform_1, window_bounds = array<i64: 16, 128>}, {pipeline_mode = #tpu.pipeline_mode<synchronous>, transform_indices = @transform_2, window_bounds = array<i64: 1, 128>}, {pipeline_mode = #tpu.pipeline_mode<synchronous>, transform_indices = @transform_3, window_bounds = array<i64: 128, 128>}, {pipeline_mode = #tpu.pipeline_mode<synchronous>, transform_indices = @transform_4, window_bounds = array<i64: 1, 128>}, {transform_indices = @transform_5, window_bounds = array<i64: 8, 128>}]} {
    %c0 = arith.constant 0 : index
    %c0_0 = arith.constant 0 : index
    %0 = vector.load %arg1[%c0, %c0_0] : memref<8x16xf32, #tpu.memory_space<vmem>>, vector<8x16xf32>
    %c0_1 = arith.constant 0 : index
    %c0_2 = arith.constant 0 : index
    %1 = vector.load %arg2[%c0_1, %c0_2] : memref<16x128xf32, #tpu.memory_space<vmem>>, vector<16x128xf32>
    %cst = arith.constant dense<0.000000e+00> : vector<8x128xf32>
    %2 = tpu.matmul %0, %1, %cst {dimension_numbers = #tpu.dot_dimension_numbers<[1], [0], [0], [1], [0, 0, 1, 1], [], []>} : vector<8x16xf32>, vector<16x128xf32>, vector<8x128xf32> -> vector<8x128xf32>
    %c0_3 = arith.constant 0 : index
    %c0_4 = arith.constant 0 : index
    %3 = vector.load %arg3[%c0_3, %c0_4] : memref<1x128xf32, #tpu.memory_space<vmem>>, vector<1x128xf32>
    %4 = vector.broadcast %3 : vector<1x128xf32> to vector<8x128xf32>
    %5 = arith.addf %2, %4 : vector<8x128xf32>
    %cst_5 = arith.constant 0.000000e+00 : f32
    %6 = vector.broadcast %cst_5 : f32 to vector<8x128xf32>
    %7 = arith.maximumf %5, %6 : vector<8x128xf32>
    %c0_6 = arith.constant 0 : index
    %c0_7 = arith.constant 0 : index
    %8 = vector.load %arg4[%c0_6, %c0_7] : memref<128x128xf32, #tpu.memory_space<vmem>>, vector<128x128xf32>
    %cst_8 = arith.constant dense<0.000000e+00> : vector<8x128xf32>
    %9 = tpu.matmul %7, %8, %cst_8 {dimension_numbers = #tpu.dot_dimension_numbers<[1], [0], [0], [1], [0, 0, 1, 1], [], []>} : vector<8x128xf32>, vector<128x128xf32>, vector<8x128xf32> -> vector<8x128xf32>
    %c0_9 = arith.constant 0 : index
    %c0_10 = arith.constant 0 : index
    %10 = vector.load %arg5[%c0_9, %c0_10] : memref<1x128xf32, #tpu.memory_space<vmem>>, vector<1x128xf32>
    %11 = vector.broadcast %10 : vector<1x128xf32> to vector<8x128xf32>
    %12 = arith.addf %9, %11 : vector<8x128xf32>
    %13 = tpu.iota {dimensions = array<i32: 1>} : vector<8x128xi32>
    %c4_i32 = arith.constant 4 : i32
    %14 = vector.broadcast %c4_i32 : i32 to vector<8x128xi32>
    %15 = arith.cmpi slt, %13, %14 : vector<8x128xi32>
    %cst_11 = arith.constant 0xFF800000 : f32
    %16 = vector.broadcast %cst_11 : f32 to vector<8x128xf32>
    %17 = arith.select %15, %12, %16 : vector<8x128xi1>, vector<8x128xf32>
    %cst_12 = arith.constant dense<0xFF800000> : vector<8xf32>
    %18 = vector.multi_reduction <maximumf>, %17, %cst_12 [1] : vector<8x128xf32> to vector<8xf32>
    %19 = vector.shape_cast %18 : vector<8xf32> to vector<8x1xf32>
    %20 = vector.broadcast %19 : vector<8x1xf32> to vector<8x128xf32>
    %21 = arith.subf %17, %20 : vector<8x128xf32>
    %22 = math.exp %21 : vector<8x128xf32>
    %cst_13 = arith.constant dense<0.000000e+00> : vector<8xf32>
    %23 = vector.multi_reduction <add>, %22, %cst_13 [1] : vector<8x128xf32> to vector<8xf32>
    %24 = vector.shape_cast %23 : vector<8xf32> to vector<8x1xf32>
    %25 = tpu.reciprocal %24 : vector<8x1xf32> -> vector<8x1xf32>
    %26 = vector.broadcast %25 : vector<8x1xf32> to vector<8x128xf32>
    %27 = arith.mulf %22, %26 : vector<8x128xf32>
    %c4_i32_14 = arith.constant 4 : i32
    %28 = vector.broadcast %c4_i32_14 : i32 to vector<8x128xi32>
    %29 = arith.cmpi eq, %13, %28 : vector<8x128xi32>
    %30 = arith.extui %29 : vector<8x128xi1> to vector<8x128xi32>
    %31 = arith.sitofp %30 : vector<8x128xi32> to vector<8x128xf32>
    %32 = arith.mulf %12, %31 : vector<8x128xf32>
    %33 = arith.addf %27, %32 : vector<8x128xf32>
    %c0_15 = arith.constant 0 : index
    %c0_16 = arith.constant 0 : index
    %34 = vector.load %arg6[%c0_15, %c0_16] : memref<8x128xf32, #tpu.memory_space<vmem>>, vector<8x128xf32>
    tpu.vector_store %arg6[%c0_15, %c0_16], %33 {strides = array<i32>} : memref<8x128xf32, #tpu.memory_space<vmem>>, vector<8x128xf32>,
    return
  }
  func.func @transform_0(%arg0: i32) -> (i32, i32) {
    %c0_i32 = arith.constant 0 : i32
    %c0_i32_0 = arith.constant 0 : i32
    return %arg0, %c0_i32 : i32, i32
  }
  func.func @transform_1(%arg0: i32) -> (i32, i32) {
    %c0_i32 = arith.constant 0 : i32
    %c0_i32_0 = arith.constant 0 : i32
    %c0_i32_1 = arith.constant 0 : i32
    return %c0_i32, %c0_i32_0 : i32, i32
  }
  func.func @transform_2(%arg0: i32) -> (i32, i32) {
    %c0_i32 = arith.constant 0 : i32
    %c0_i32_0 = arith.constant 0 : i32
    %c0_i32_1 = arith.constant 0 : i32
    return %c0_i32, %c0_i32_0 : i32, i32
  }
  func.func @transform_3(%arg0: i32) -> (i32, i32) {
    %c0_i32 = arith.constant 0 : i32
    %c0_i32_0 = arith.constant 0 : i32
    %c0_i32_1 = arith.constant 0 : i32
    return %c0_i32, %c0_i32_0 : i32, i32
  }
  func.func @transform_4(%arg0: i32) -> (i32, i32) {
    %c0_i32 = arith.constant 0 : i32
    %c0_i32_0 = arith.constant 0 : i32
    %c0_i32_1 = arith.constant 0 : i32
    return %c0_i32, %c0_i32_0 : i32, i32
  }
  func.func @transform_5(%arg0: i32) -> (i32, i32) {
    %c0_i32 = arith.constant 0 : i32
    %c0_i32_0 = arith.constant 0 : i32
    return %arg0, %c0_i32 : i32, i32
  }
}

</mosaic_0001>

<bundles_post_ra>
// kernel: actor_critic_forward.1
= control target key start
LH: loop header
LB: loop body
LE: loop exit
PB: predicated region body
PF: predicated region fallthrough
CT: control target
= control target key end

     0   :  { %10 = vsyncpa [#allocation3], 0  ;;  %s516_s0 = inlined_call_operand.hbm [shape: f32[8,16], index: 0, kind: input, shape index: {}]   ;;  %s517_s1 = inlined_call_operand.hbm [shape: f32[16,128], index: 1, kind: input, shape index: {}]   ;;  %s518_s2 = inlined_call_operand.vmem [shape: f32[1,128], index: 2, kind: input, shape index: {}]   ;;  %s519_s3 = inlined_call_operand.hbm [shape: f32[128,128], index: 3, kind: input, shape index: {}]   ;;  %s520_s4 = inlined_call_operand.hbm [shape: f32[1,128], index: 4, kind: input, shape index: {}]   ;;  %s521_s5 = inlined_call_operand.vmem [shape: f32[8,128], index: 5, kind: output, shape index: {}]  }
   0x1   :  { %11 = vsyncpa [#allocation5], 0 }
   0x2   :  { %12 = vsyncpa [#allocation8], 0  ;;  %s439_s18 = smov [#allocation4]  }
   0x3   :  { %s28_s19 = sshll.u32 %s439_s18, 4  ;;  %s29_s19 = int_to_ptr.vmem [resolvable:$true] %s28_s19 }
   0x4   :  { %s361_s20 = scalar_lea.vmem %s29_s19, 256  ;;  %p366_p1 = scmp.lt.s32.totalorder %s29_s19, %s29_s19 }
   0x5   :  { %p362_p0 = scmp.ne.s32.totalorder %s29_s19, %s361_s20  ;;  %p367_p2 = scmp.lt.s32.totalorder %s361_s20, %s361_s20 }
   0x7   :  { %p368_p3 = por %p367_p2, %p366_p1 }
   0x9   :  { %p369_p4 = pnand %p368_p3, %p362_p0 }
   0xb   :  { %372 = shalt.err (!%p369_p4)
}
   0xc   :  { %s440_s21 = smov 128   ;;  %s441_s22 = smov 8  }
   0xd   :  { %34 = dma.hbm_to_vmem [thread:$0]  %s517_s1, 256, %s29_s19, [#allocation5], %s440_s21, %s440_s21, %s441_s22  }
   0xe   :  { %s442_s25 = smov [#allocation2]   ;;  %s443_s27 = smov [#allocation6]  }
   0xf   :  { %s19_s26 = sshll.u32 %s442_s25, 4  ;;  %s42_s28 = sshll.u32 %s443_s27, 4  ;;  %s20_s26 = int_to_ptr.vmem [resolvable:$true] %s19_s26  ;;  %s43_s28 = int_to_ptr.vmem [resolvable:$true] %s42_s28 }
  0x10   :  { %s381_s29 = scalar_lea.vmem %s20_s26, 128  ;;  %p386_p6 = scmp.lt.s32.totalorder %s20_s26, %s20_s26 }
  0x11   :  { %p382_p5 = scmp.ne.s32.totalorder %s20_s26, %s381_s29  ;;  %p387_p7 = scmp.lt.s32.totalorder %s381_s29, %s381_s29 }
  0x13   :  { %p388_p8 = por %p387_p7, %p386_p6 }
  0x15   :  { %p389_p9 = pnand %p388_p8, %p382_p5 }
  0x17   :  { %392 = shalt.err (!%p389_p9)
}
  0x18   :  { %22 = dma.hbm_to_vmem [thread:$0]  %s516_s0, 128, %s20_s26, [#allocation3]  }
  0x19   :  { %s401_s7 = scalar_lea.vmem %s43_s28, 2048  ;;  %p406_p11 = scmp.lt.s32.totalorder %s43_s28, %s43_s28 }
  0x1a   :  { %p402_p10 = scmp.ne.s32.totalorder %s43_s28, %s401_s7  ;;  %p407_p12 = scmp.lt.s32.totalorder %s401_s7, %s401_s7 }
  0x1c   :  { %p408_p13 = por %p407_p12, %p406_p11 }
  0x1e   :  { %p409_p0 = pnand %p408_p13, %p402_p10 }
  0x20   :  { %412 = shalt.err (!%p409_p0)
}
  0x21   :  { %48 = dma.hbm_to_vmem [thread:$0]  %s519_s3, 2048, %s43_s28, [#allocation5], %s440_s21, %s440_s21, %s441_s22  }
  0x22   :  { %s444_s9 = smov [#allocation7]  }
  0x23   :  { %s55_s10 = sshll.u32 %s444_s9, 4  ;;  %s56_s10 = int_to_ptr.vmem [resolvable:$true] %s55_s10 }
  0x24   :  { %s421_s11 = scalar_lea.vmem %s56_s10, 16  ;;  %s425_s12 = scalar_lea.vmem %s56_s10, 32 }
  0x25   :  { %p422_p1 = scmp.ne.s32.totalorder %s56_s10, %s421_s11  ;;  %p426_p2 = scmp.lt.s32.totalorder %s56_s10, %s56_s10 }
  0x26   :  { %p427_p3 = scmp.lt.s32.totalorder %s425_s12, %s421_s11 }
  0x28   :  { %p428_p4 = por %p427_p3, %p426_p2 }
  0x2a   :  { %p429_p5 = pnand %p428_p4, %p422_p1 }
  0x2c   :  { %432 = shalt.err (!%p429_p5)
}
  0x2d   :  { %58 = dma.hbm_to_vmem [thread:$0]  %s520_s4, 16, %s56_s10, [#allocation8]  }
  0x2e   :  { %433 = dma.done.wait [#allocation3], 128  }
  0x2f   :  { %434 = vsyncadd [#allocation3], 4294967168 }
  0x30   :  { %435 = dma.done.wait [#allocation5], 2304  }
  0x31   :  { %436 = vsyncadd [#allocation5], 4294964992 }
  0x32   :  { %437 = dma.done.wait [#allocation8], 16  }
  0x33   :  { %438 = vsyncadd [#allocation8], 4294967280  ;;  %v445_v0 = vmov 0.0   ;;  %vm446_vm0 = vmmov 0   ;;  %v73_v1 = vld [vmem:[#allocation4 + $0x8] sm:$0xff]  ;;  %v72_v2 = vld [vmem:[#allocation4] sm:$0xff]  ;;  %v249_v25 = vlaneseq }
  0x34   :  { %299 = vmatprep.subr.mxu0 %v445_v0  ;;  %303 = vmatprep.mubr.msk.f32.mxu0 %vm446_vm0, %v445_v0  ;;  %v71_v3 = vld [vmem:[#allocation2] sm:$0xff]  ;;  %vm81_vm1 = vcmask 130048   ;;  %v171_v4 = vld [vmem:[#allocation6 + $0x78] sm:$0xff]  ;;  %v170_v5 = vld [vmem:[#allocation6 + $0x70] sm:$0xff] }
  0x35   :  { %306 = vmatprep.subr.mxu1 %v445_v0  ;;  %338 = vmatprep.mubr.msk.f32.mxu1 %vm446_vm0, %v445_v0  ;;  %v169_v6 = vld [vmem:[#allocation6 + $0x68] sm:$0xff]  ;;  %v168_v7 = vld [vmem:[#allocation6 + $0x60] sm:$0xff]  ;;  %v167_v8 = vld [vmem:[#allocation6 + $0x58] sm:$0xff]  ;;  %v250_v26 = vand.u32 127, %v249_v25 }
  0x36   :  { %300 = vmatpush3.msra.mxu0 %v73_v1  ;;  %307 = vmatpush3.msra.mxu1 %v171_v4  ;;  %v166_v9 = vld [vmem:[#allocation6 + $0x50] sm:$0xff]  ;;  %v165_v10 = vld [vmem:[#allocation6 + $0x48] sm:$0xff]  ;;  %v164_v11 = vld [vmem:[#allocation6 + $0x40] sm:$0xff] }
  0x37   :  { %301 = vmatprep.subr.mxu0 %v445_v0  ;;  %308 = vmatprep.subr.mxu1 %v445_v0  ;;  %v163_v12 = vld [vmem:[#allocation6 + $0x38] sm:$0xff]  ;;  %v162_v13 = vld [vmem:[#allocation6 + $0x30] sm:$0xff]  ;;  %v161_v14 = vld [vmem:[#allocation6 + $0x28] sm:$0xff]  ;;  %vm262_vm2 = vcmp.eq.s32.totalorder %v250_v26, 4  ;;  %vm251_vm3 = vcmp.lt.s32.totalorder %v250_v26, 4 }
  0x38   :  { %302 = vmatpush3.msra.mxu0 %v72_v2  ;;  %309 = vmatpush3.msra.mxu1 %v170_v5  ;;  %v160_v15 = vld [vmem:[#allocation6 + $0x20] sm:$0xff]  ;;  %v159_v16 = vld [vmem:[#allocation6 + $0x18] sm:$0xff]  ;;  %v158_v17 = vld [vmem:[#allocation6 + $0x10] sm:$0xff]  ;;  %v278_v29 = vsel %vm262_vm2, 1.0, %v445_v0 }
  0x39   :  { %304 = vmatmul.mubr.msk.f32.vlgmr.msra.gmra.mxu0 %vm81_vm1, %v71_v3  ;;  %310 = vmatprep.subr.mxu1 %v445_v0  ;;  %v157_v18 = vld [vmem:[#allocation6 + $0x8] sm:$0xff]  ;;  %v156_v19 = vld [vmem:[#allocation6] sm:$0xff] }
  0x3a   :  { %311 = vmatpush3.msra.mxu1 %v169_v6  ;;  %v275_v20 = vld [vmem:[%s518_s2] ss:$0 sm:$0xff]  ;;  %v277_v27 = vld [vmem:[#allocation7] ss:$0 sm:$0xff] }
  0x3b   :  { %312 = vmatprep.subr.mxu1 %v445_v0 }
  0x3c   :  { %313 = vmatpush3.msra.mxu1 %v168_v7 }
  0x3d   :  { %314 = vmatprep.subr.mxu1 %v445_v0 }
  0x3e   :  { %315 = vmatpush3.msra.mxu1 %v167_v8 }
  0x3f   :  { %316 = vmatprep.subr.mxu1 %v445_v0 }
  0x40   :  { %317 = vmatpush3.msra.mxu1 %v166_v9 }
  0x41   :  { %318 = vmatprep.subr.mxu1 %v445_v0 }
  0x42   :  { %319 = vmatpush3.msra.mxu1 %v165_v10 }
  0x43   :  { %320 = vmatprep.subr.mxu1 %v445_v0 }
  0x44   :  { %321 = vmatpush3.msra.mxu1 %v164_v11 }
  0x45   :  { %322 = vmatprep.subr.mxu1 %v445_v0 }
  0x46   :  { %323 = vmatpush3.msra.mxu1 %v163_v12 }
  0x47   :  { %324 = vmatprep.subr.mxu1 %v445_v0 }
  0x48   :  { %325 = vmatpush3.msra.mxu1 %v162_v13 }
  0x49   :  { %326 = vmatprep.subr.mxu1 %v445_v0 }
  0x4a   :  { %327 = vmatpush3.msra.mxu1 %v161_v14 }
  0x4b   :  { %328 = vmatprep.subr.mxu1 %v445_v0 }
  0x4c   :  { %329 = vmatpush3.msra.mxu1 %v160_v15 }
  0x4d   :  { %330 = vmatprep.subr.mxu1 %v445_v0 }
  0x4e   :  { %331 = vmatpush3.msra.mxu1 %v159_v16 }
  0x4f   :  { %332 = vmatprep.subr.mxu1 %v445_v0 }
  0x50   :  { %333 = vmatpush3.msra.mxu1 %v158_v17 }
  0x51   :  { %334 = vmatprep.subr.mxu1 %v445_v0 }
  0x52   :  { %335 = vmatpush3.msra.mxu1 %v157_v18 }
  0x53   :  { %336 = vmatprep.subr.mxu1 %v445_v0 }
  0x54   :  { %337 = vmatpush3.msra.mxu1 %v156_v19 }
  0xf9   :  { %v151_v21 = vpop.f32.mrf.mxu0 }
  0xfa   :  { %v152_v22 = vadd.f32 %v275_v20, %v151_v21 }
  0xfb   :  { %v305_v23 = vpop.f32.mrf.mxu0 }
  0xfc   :  { %v155_v24 = vmax.f32 %v152_v22, 0.0 }
  0xfe   :  { %339 = vmatmul.mubr.f32.vlgmr.msra.gmra.mxu1 %v155_v24 }
 0x1be   :  { %v245_v28 = vpop.f32.mrf.mxu1 }
 0x1bf   :  { %v246_v30 = vadd.f32 %v277_v27, %v245_v28 }
 0x1c0   :  { %v340_v31 = vpop.f32.mrf.mxu1 }
 0x1c1   :  { %v265_v32 = vmul.f32 %v278_v29, %v246_v30  ;;  %v252_v33 = vsel %vm251_vm3, %v246_v30, -inf }
 0x1c2   :  { %253 = vmax.xlane.f32.xlu0 %v252_v33 }
 0x24b   :  { %v254_v34 = vpop.xlane.xlu0 %253 }
 0x24c   :  { %v255_v35 = vsub.f32 %v252_v33, %v254_v34 }
 0x24e   :  { %v256_v36 = vmul.f32 1.442695, %v255_v35 }
 0x250   :  { %349 = vpow2.f32 %v256_v36 }
 0x25d   :  { %v350_v37 = vpop.eup %349 }
 0x25e   :  { %258 = vadd.xlane.f32.xlu0 %v350_v37 }
 0x2e7   :  { %v259_v38 = vpop.xlane.xlu0 %258 }
 0x2e8   :  { %351 = vrcp.f32 %v259_v38 }
 0x2f5   :  { %v352_v39 = vpop.eup %351 }
 0x2f6   :  { %v261_v40 = vmul.f32 %v352_v39, %v350_v37 }
 0x2f8   :  { %v266_v41 = vadd.f32 %v265_v32, %v261_v40 }
 0x2fa   :  { %267 = vst [vmem:[%s521_s5] sm:$0xff] %v266_v41 }
 0x2fb   :  { %272 = vsyncpa [#allocation3], 1 }
 0x2fc   :  { %273 = vsyncpa [#allocation5], 1 }
 0x2fd   :  { %274 = vsyncpa [#allocation8], 1 }

</bundles_post_ra>
